<compile_context>
chip_gen: v6e
topology: v6e:2x2x1
jax: 0.10.0
libtpu: 0.0.40
codegen_flags: <defaults>
</compile_context>

<pallas_src>
import jax
import jax.numpy as jnp
import numpy as np
from jax import lax
from jax.experimental import pallas as pl
from jax.experimental.pallas import tpu as pltpu


# ----------------------------------------------------------------------------
# Startup probes (run once, on the same backend the main kernel will use).
# ----------------------------------------------------------------------------
def _probe_roll_sign():
    """Pin the pltpu.roll shift convention empirically (jnp.roll-like => +1)."""
    def k(x_ref, o_ref):
        o_ref[...] = pltpu.roll(x_ref[...], 1, axis=1)

    x = jnp.arange(8 * 128, dtype=jnp.float32).reshape(8, 128)
    y = pl.pallas_call(k, out_shape=jax.ShapeDtypeStruct((8, 128), jnp.float32))(x)
    # jnp.roll convention: y[0, 0] == x[0, 127] == 127.0
    return 1 if float(y[0, 0]) == 127.0 else -1


def _probe_buffered_one():
    """Check whether pipeline_mode=pl.Buffered(1) (single-buffered grid-invariant
    inputs) is accepted by this Pallas build; fall back gracefully if not."""
    try:
        spec = pl.BlockSpec((8, 128), lambda i: (0, 0), pipeline_mode=pl.Buffered(1))

        def k(x_ref, o_ref):
            o_ref[...] = x_ref[...] + 1.0

        x = jnp.zeros((8, 128), jnp.float32)
        y = pl.pallas_call(
            k,
            out_shape=jax.ShapeDtypeStruct((8, 128), jnp.float32),
            grid=(2,),
            in_specs=[spec],
            out_specs=pl.BlockSpec((8, 128), lambda i: (0, 0)),
        )(x)
        jax.block_until_ready(y)
        return True
    except Exception:
        return False


# ----------------------------------------------------------------------------
# Exact GELU in-kernel (erf via Abramowitz-Stegun 7.1.26, |err| <= 1.5e-7) --
# only mul/add/div/exp/select, all of which lower on the VPU/EUP.
# ----------------------------------------------------------------------------
def _erf(z):
    s = jnp.where(z >= 0.0, 1.0, -1.0)
    az = z * s
    t = 1.0 / (1.0 + 0.3275911 * az)
    poly = ((((1.061405429 * t - 1.453152027) * t + 1.421413741) * t
             - 0.284496736) * t + 0.254829592) * t
    return s * (1.0 - poly * jnp.exp(-az * az))


def _gelu(x):
    return 0.5 * x * (1.0 + _erf(x * 0.7071067811865476))


# ----------------------------------------------------------------------------
# Fused kernel builder
# ----------------------------------------------------------------------------
def _build_kernel(C, D, H, W, roll_sign):
    S = D * H * W
    HW = H * W

    def roll_lanes(v, k):
        # convention (roll_sign folds hardware direction): out[s] = v[s - k]  (mod S)
        k = (roll_sign * k) % S
        if k == 0:
            return v
        return pltpu.roll(v, k, axis=1)

    def dw_conv(x, mw_ref, b_ref, K, unroll_kd):
        """Depthwise KxKxK 'same' conv on x laid out as (C, D*H*W).

        mw_ref: (K^3, C, S) pre-combined masked-weight table, tap-major (kd,kh,kw):
                mw[t, c, s] = weight[c, kd, kh, kw] * boundary_valid(t, s).
        """
        p = K // 2
        x0 = roll_lanes(x, p * (HW + W + 1))          # aligned with tap (0, 0, 0)
        zero = jnp.zeros((C, S), jnp.float32)

        def taps_for_kd(kd, acc0, acc1, xr_d):
            # kd static (python int) or dynamic (fori index); kh/kw always static.
            for kh in range(K):
                xr_h = roll_lanes(xr_d, -(kh * W)) if kh else xr_d
                for kw in range(K):
                    xr = roll_lanes(xr_h, -kw) if kw else xr_h
                    t = kd * (K * K) + (kh * K + kw)          # leading-dim index only
                    contrib = xr * mw_ref[t].astype(jnp.float32)
                    if (kh * K + kw) % 2 == 0:                # 2 independent acc chains
                        acc0 = acc0 + contrib
                    else:
                        acc1 = acc1 + contrib
            return acc0, acc1

        if unroll_kd:
            acc0, acc1, xr_d = zero, zero, x0
            for kd in range(K):
                acc0, acc1 = taps_for_kd(kd, acc0, acc1, xr_d)
                if kd + 1 < K:
                    xr_d = roll_lanes(xr_d, -HW)
        else:
            def kd_body(kd, carry):
                xr_d, a0, a1 = carry
                a0, a1 = taps_for_kd(kd, a0, a1, xr_d)
                return roll_lanes(xr_d, -HW), a0, a1

            _, acc0, acc1 = lax.fori_loop(0, K, kd_body, (x0, zero, zero))

        return acc0 + acc1 + b_ref[...]                       # single final bias add

    def matmul(w_ref, v, b_ref):
        # pointwise (1x1x1) conv: (C_out, C_in) @ (C_in, S); default MXU precision
        return jnp.dot(w_ref[...], v, preferred_element_type=jnp.float32) + b_ref[...]

    def kernel(x_ref,
               wca1_ref, bca1_ref, wca2_ref, bca2_ref,
               wp1_ref, bp1_ref,
               mw5_ref, b5_ref,
               mw11_ref, b11_ref,
               wc1_ref, bc1_ref,
               wp2_ref, bp2_ref,
               o_ref):
        x = x_ref[...]                                        # (C, S) f32

        # ---- channel attention gate (AdaptiveAvgPool3d + 1x1 convs, BN folded) ----
        pooled = jnp.sum(x, axis=1, keepdims=True) * (1.0 / S)   # (C, 1)
        pooled = jnp.broadcast_to(pooled, (C, 128))              # one vreg wide
        z = jnp.maximum(matmul(wca1_ref, pooled, bca1_ref), 0.0)
        z = matmul(wca2_ref, z, bca2_ref)
        gate = jax.nn.sigmoid(z[:, 0:1])                      # only column 0 is used

        # ---- spatial attention path ----
        g = _gelu(matmul(wp1_ref, x, bp1_ref))                # proj_1 + GELU
        a = dw_conv(g, mw5_ref, b5_ref, 5, unroll_kd=True)    # conv0: depthwise 5^3
        a = dw_conv(a, mw11_ref, b11_ref, 11, unroll_kd=False)  # conv_spatial: 11^3
        a = matmul(wc1_ref, a, bc1_ref)                       # conv1: 1x1x1
        sgu = a * g                                           # attn * u
        xs = matmul(wp2_ref, sgu, bp2_ref) + x                # proj_2 + residual

        o_ref[...] = xs * gate                                # * sigmoid(channel att)

    return kernel


# ----------------------------------------------------------------------------
# Host-side parameter preparation
# ----------------------------------------------------------------------------
def _dw_masked_weight_table(w, b, D, H, W, K, table_dtype):
    """Pre-combine depthwise weights with boundary-validity masks into one dense
    per-tap table mw[t, c, s] = w[c, kd, kh, kw] * valid(t, s), t = kd*K^2 + kh*K + kw."""
    C = w.shape[0]
    S = D * H * W
    p = K // 2
    s = np.arange(S)
    d = (s // (H * W)).reshape(1, 1, 1, S)
    h = ((s // W) % H).reshape(1, 1, 1, S)
    ww = (s % W).reshape(1, 1, 1, S)
    kd = np.arange(K).reshape(K, 1, 1, 1) - p
    kh = np.arange(K).reshape(1, K, 1, 1) - p
    kw = np.arange(K).reshape(1, 1, K, 1) - p
    valid = ((d + kd >= 0) & (d + kd < D) &
             (h + kh >= 0) & (h + kh < H) &
             (ww + kw >= 0) & (ww + kw < W)).astype(np.float32)      # (K,K,K,S)
    wt = np.asarray(w, np.float32).transpose(1, 2, 3, 0).reshape(K * K * K, C, 1)
    mw = wt * valid.reshape(K * K * K, 1, S)                          # (K^3, C, S)
    return jnp.asarray(mw, table_dtype), jnp.asarray(b, jnp.float32).reshape(C, 1)


def init_params(key, C, r=4):
    Ci = C // r
    k = list(jax.random.split(key, 24))

    def u(kk, shape, fan_in):
        bound = 1.0 / float(np.sqrt(fan_in))
        return jax.random.uniform(kk, shape, jnp.float32, -bound, bound)

    P = {}
    # channel_att: Conv(C->Ci,1) -> BN -> ReLU -> Conv(Ci->C,1) -> BN
    P["w_ca1"], P["b_ca1"] = u(k[0], (Ci, C), C), u(k[1], (Ci,), C)
    P["w_ca2"], P["b_ca2"] = u(k[2], (C, Ci), Ci), u(k[3], (C,), Ci)
    P["bn1_g"] = jax.random.uniform(k[4], (Ci,), jnp.float32, 0.5, 1.5)
    P["bn1_b"] = jax.random.uniform(k[5], (Ci,), jnp.float32, -0.2, 0.2)
    P["bn1_m"] = jax.random.uniform(k[6], (Ci,), jnp.float32, -0.2, 0.2)
    P["bn1_v"] = jax.random.uniform(k[7], (Ci,), jnp.float32, 0.5, 1.5)
    P["bn2_g"] = jax.random.uniform(k[8], (C,), jnp.float32, 0.5, 1.5)
    P["bn2_b"] = jax.random.uniform(k[9], (C,), jnp.float32, -0.2, 0.2)
    P["bn2_m"] = jax.random.uniform(k[10], (C,), jnp.float32, -0.2, 0.2)
    P["bn2_v"] = jax.random.uniform(k[11], (C,), jnp.float32, 0.5, 1.5)
    # SpatialAttention: proj_1, AttentionModule1(conv0, conv_spatial, conv1), proj_2
    P["w_p1"], P["b_p1"] = u(k[12], (C, C), C), u(k[13], (C,), C)
    P["w_dw5"], P["b_dw5"] = u(k[14], (C, 5, 5, 5), 5 ** 3), u(k[15], (C,), 5 ** 3)
    P["w_dw11"], P["b_dw11"] = u(k[16], (C, 11, 11, 11), 11 ** 3), u(k[17], (C,), 11 ** 3)
    P["w_c1"], P["b_c1"] = u(k[18], (C, C), C), u(k[19], (C,), C)
    P["w_p2"], P["b_p2"] = u(k[20], (C, C), C), u(k[21], (C,), C)
    return P


def prepare_params(P, C, D, H, W, r=4, eps=1e-5, table_dtype=jnp.float32):
    """Fold BN (inference mode) into the channel-att 1x1 convs, pad C//r -> C,
    build pre-combined depthwise masked-weight tables, reshape biases to (C,1)."""
    Ci = C // r

    def fold(wc, bc, g, b, m, v):
        scale = g / jnp.sqrt(v + eps)
        return wc * scale[:, None], (bc - m) * scale + b

    w1f, b1f = fold(P["w_ca1"], P["b_ca1"], P["bn1_g"], P["bn1_b"], P["bn1_m"], P["bn1_v"])
    w2f, b2f = fold(P["w_ca2"], P["b_ca2"], P["bn2_g"], P["bn2_b"], P["bn2_m"], P["bn2_v"])
    wca1 = jnp.zeros((C, C), jnp.float32).at[:Ci, :].set(w1f)
    bca1 = jnp.zeros((C, 1), jnp.float32).at[:Ci, 0].set(b1f)
    wca2 = jnp.zeros((C, C), jnp.float32).at[:, :Ci].set(w2f)
    bca2 = b2f.reshape(C, 1)

    mw5, b5 = _dw_masked_weight_table(P["w_dw5"], P["b_dw5"], D, H, W, 5, table_dtype)
    mw11, b11 = _dw_masked_weight_table(P["w_dw11"], P["b_dw11"], D, H, W, 11, table_dtype)

    return (wca1, bca1, wca2, bca2,
            P["w_p1"], P["b_p1"].reshape(C, 1),
            mw5, b5, mw11, b11,
            P["w_c1"], P["b_c1"].reshape(C, 1),
            P["w_p2"], P["b_p2"].reshape(C, 1))


# ----------------------------------------------------------------------------
# Wrapper: one fused pallas_call, grid over the batch
# ----------------------------------------------------------------------------
def global_attention_forward(x, prep, roll_sign, single_buffer_consts):
    """x: (N, C, D, H, W) float32 (PyTorch NCDHW layout)."""
    N, C, D, H, W = x.shape
    S = D * H * W
    assert S % 128 == 0, "flattened spatial size must be lane aligned"

    kernel = _build_kernel(C, D, H, W, roll_sign)
    x2 = x.reshape(N, C, S)

    def const_spec(shape):
        nd = len(shape)
        idx = lambda n, _nd=nd: (0,) * _nd
        if single_buffer_consts:
            # grid-invariant constants: single-buffered, loaded once
            return pl.BlockSpec(shape, idx, pipeline_mode=pl.Buffered(1))
        return pl.BlockSpec(shape, idx)

    out = pl.pallas_call(
        kernel,
        out_shape=jax.ShapeDtypeStruct((N, C, S), jnp.float32),
        grid=(N,),
        in_specs=[pl.BlockSpec((None, C, S), lambda n: (n, 0, 0))]
                 + [const_spec(p.shape) for p in prep],
        out_specs=pl.BlockSpec((None, C, S), lambda n: (n, 0, 0)),
        compiler_params=pltpu.CompilerParams(
            dimension_semantics=("parallel",),          # batch axis -> megacore on v7x
            vmem_limit_bytes=50 * 1024 * 1024,          # tables ~23 MiB (worst case ~46)
        ),
    )(x2, *prep)
    return out.reshape(N, C, D, H, W)


# ----------------------------------------------------------------------------
# Pure-JAX reference (NCDHW, matches PyTorch forward, inference-mode BN)
# ----------------------------------------------------------------------------
def reference_forward(x, P, eps=1e-5):
    hi = lax.Precision.HIGHEST

    def conv1x1(v, w, b):
        y = jnp.einsum("ncdhw,oc->nodhw", v, w, precision=hi)
        return y + b.reshape(1, -1, 1, 1, 1)

    def bn(v, g, b, m, var):
        s = g / jnp.sqrt(var + eps)
        return (v - m.reshape(1, -1, 1, 1, 1)) * s.reshape(1, -1, 1, 1, 1) \
            + b.reshape(1, -1, 1, 1, 1)

    def dwconv(v, w, b, K):
        C = v.shape[1]
        y = lax.conv_general_dilated(
            v, w[:, None], window_strides=(1, 1, 1),
            padding=[(K // 2, K // 2)] * 3,
            dimension_numbers=("NCDHW", "OIDHW", "NCDHW"),
            feature_group_count=C, precision=hi)
        return y + b.reshape(1, -1, 1, 1, 1)

    # channel attention
    pooled = jnp.mean(x, axis=(2, 3, 4), keepdims=True)
    z = conv1x1(pooled, P["w_ca1"], P["b_ca1"])
    z = jnp.maximum(bn(z, P["bn1_g"], P["bn1_b"], P["bn1_m"], P["bn1_v"]), 0.0)
    z = conv1x1(z, P["w_ca2"], P["b_ca2"])
    x_c = bn(z, P["bn2_g"], P["bn2_b"], P["bn2_m"], P["bn2_v"])

    # spatial attention
    g = jax.nn.gelu(conv1x1(x, P["w_p1"], P["b_p1"]), approximate=False)
    a = dwconv(g, P["w_dw5"], P["b_dw5"], 5)
    a = dwconv(a, P["w_dw11"], P["b_dw11"], 11)
    a = conv1x1(a, P["w_c1"], P["b_c1"])
    sgu = a * g
    x_s = conv1x1(sgu, P["w_p2"], P["b_p2"]) + x
    return x_s * jax.nn.sigmoid(x_c)


# ----------------------------------------------------------------------------
# main
# ----------------------------------------------------------------------------
if __name__ == "__main__":
    N, C, D, H, W = 2, 8, 8, 8, 8                 # GlobalAttention(channels=8, r=4)

    roll_sign = _probe_roll_sign()                # calibrate pltpu.roll convention
    buf1_ok = _probe_buffered_one()               # single-buffered consts supported?
    # f32 tables when single-buffering works (no per-tap converts);
    # bf16 tables otherwise so the double-buffered footprint stays small.
    table_dtype = jnp.float32 if buf1_ok else jnp.bfloat16

    key = jax.random.PRNGKey(0)
    kx, kp = jax.random.split(key)
    x = jax.random.normal(kx, (N, C, D, H, W), jnp.float32)
    P = init_params(kp, C)
    prep = prepare_params(P, C, D, H, W, table_dtype=table_dtype)

    fwd = jax.jit(lambda xx, pp: global_attention_forward(xx, pp, roll_sign, buf1_ok))
    out = jax.block_until_ready(fwd(x, prep))

    ref = reference_forward(x, P)
    np.testing.assert_allclose(np.asarray(out), np.asarray(ref), rtol=2e-2, atol=1e-2)
    print("KERNEL_OK")
</pallas_src>

<mosaic_0001>
module attributes {stable_mosaic.version = 11 : i64} {
  func.func @k(%arg0: memref<8x128xf32, #tpu.memory_space<vmem>>, %arg1: memref<8x128xf32, #tpu.memory_space<vmem>>) attributes {dimension_semantics = [], scalar_prefetch = 0 : i64, scratch_operands = 0 : i64, tpu.core_type = #tpu.core_type<tc>} {
    %c0 = arith.constant 0 : index
    %c0_0 = arith.constant 0 : index
    %0 = vector.load %arg0[%c0, %c0_0] : memref<8x128xf32, #tpu.memory_space<vmem>>, vector<8x128xf32>
    %c1_i32 = arith.constant 1 : i32
    %1 = tpu.dynamic_rotate %0 by %c1_i32 dim 1 : vector<8x128xf32>, i32 -> vector<8x128xf32>
    %c0_1 = arith.constant 0 : index
    %c0_2 = arith.constant 0 : index
    %2 = vector.load %arg1[%c0_1, %c0_2] : memref<8x128xf32, #tpu.memory_space<vmem>>, vector<8x128xf32>
    tpu.vector_store %arg1[%c0_1, %c0_2], %1 {strides = array<i32>} : memref<8x128xf32, #tpu.memory_space<vmem>>, vector<8x128xf32>,
    return
  }
}

</mosaic_0001>

<bundles_post_ra>
// kernel: tpu_custom_call.1
= control target key start
LH: loop header
LB: loop body
LE: loop exit
PB: predicated region body
PF: predicated region fallthrough
CT: control target
= control target key end

     0   :  { %6 = vsyncpa [#allocation3], 0  ;;  %s106_s0 = inlined_call_operand.hbm [shape: f32[8,128], index: 0, kind: input, shape index: {}]   ;;  %s107_s1 = inlined_call_operand.hbm [shape: f32[8,128], index: 1, kind: output, shape index: {}]  }
   0x1   :  { %7 = vsyncpa [#allocation4], 0  ;;  %s87_s6 = smov [#allocation2]  }
   0x2   :  { %s14_s7 = sshll.u32 %s87_s6, 4  ;;  %s15_s7 = int_to_ptr.vmem [resolvable:$true] %s14_s7 }
   0x3   :  { %s51_s8 = scalar_lea.vmem %s15_s7, 128  ;;  %p56_p1 = scmp.lt.s32.totalorder %s15_s7, %s15_s7 }
   0x4   :  { %p52_p0 = scmp.ne.s32.totalorder %s15_s7, %s51_s8  ;;  %p57_p2 = scmp.lt.s32.totalorder %s51_s8, %s51_s8 }
   0x6   :  { %p58_p3 = por %p57_p2, %p56_p1 }
   0x8   :  { %p59_p4 = pnand %p58_p3, %p52_p0 }
   0xa   :  { %62 = shalt.err (!%p59_p4)
}
   0xb   :  { %17 = dma.hbm_to_vmem [thread:$0]  %s106_s0, 128, %s15_s7, [#allocation3]  }
   0xc   :  { %83 = dma.done.wait [#allocation3], 128  }
   0xd   :  { %84 = vsyncadd [#allocation3], 4294967168  ;;  %v21_v0 = vld [vmem:[#allocation2] sm:$0xff]  ;;  %s88_s11 = smov 1   ;;  %s89_s12 = smov [#allocation5]  }
   0xe   :  { %22 = vrot.lane.b32.xlu0 %v21_v0, %s88_s11  ;;  %s31_s13 = sshll.u32 %s89_s12, 4  ;;  %s32_s13 = int_to_ptr.vmem [resolvable:$true] %s31_s13 }
   0xf   :  { %s63_s14 = scalar_lea.vmem %s32_s13, 128  ;;  %p68_p6 = scmp.lt.s32.totalorder %s32_s13, %s32_s13 }
  0x10   :  { %p64_p5 = scmp.ne.s32.totalorder %s32_s13, %s63_s14  ;;  %p69_p7 = scmp.lt.s32.totalorder %s63_s14, %s63_s14 }
  0x12   :  { %p70_p8 = por %p69_p7, %p68_p6 }
  0x14   :  { %p71_p9 = pnand %p70_p8, %p64_p5 }
  0x80   :  { %v23_v1 = vpop.permute.xlu0 %22 }
  0x81   :  { %24 = vst [vmem:[#allocation5] sm:$0xff] %v23_v1 }
  0x82   :  { %74 = shalt.err (!%p71_p9)
}
  0x83   :  { %34 = dma.vmem_to_hbm [thread:$0]  %s32_s13, 128, %s107_s1, [#allocation4]  }
  0x84   :  { %85 = dma.done.wait [#allocation4], 128  }
  0x85   :  { %86 = vsyncadd [#allocation4], 4294967168 }
  0x86   :  { %38 = vsyncpa [#allocation3], 1 }
  0x87   :  { %39 = vsyncpa [#allocation4], 1 }

</bundles_post_ra>
